<compile_context>
chip_gen: v5e
topology: v5e:2x2
jax: 0.10.0
libtpu: 0.0.40
codegen_flags: <defaults>
</compile_context>

<pallas_src>
import functools

import numpy as np

import jax
import jax.numpy as jnp
from jax.experimental import pallas as pl
from jax.experimental.pallas import tpu as pltpu

_IMGS_PER_STEP = 2  # images per grid step: keeps the 8x8 stage at 2*64 = 128 lanes


# ---------------------------------------------------------------------------
# pltpu.roll rotation-convention probe (one tiny one-off kernel, cached)
# ---------------------------------------------------------------------------
_ROLL_SIGN = None


def _get_roll_sign():
    """+1 if pltpu.roll follows np.roll (out[i] = x[(i - shift) % N]), else -1."""
    global _ROLL_SIGN
    if _ROLL_SIGN is None:
        x = jnp.arange(8 * 128, dtype=jnp.float32).reshape(8, 128)

        def probe(x_ref, o_ref):
            o_ref[...] = pltpu.roll(x_ref[...], 1, 1)

        y = pl.pallas_call(
            probe, out_shape=jax.ShapeDtypeStruct((8, 128), jnp.float32))(x)
        ref = np.roll(np.arange(8 * 128, dtype=np.float32).reshape(8, 128), 1, axis=1)
        _ROLL_SIGN = 1 if np.array_equal(np.asarray(jax.device_get(y)), ref) else -1
    return _ROLL_SIGN


# ---------------------------------------------------------------------------
# in-kernel helpers (operate on loaded VMEM values)
# ---------------------------------------------------------------------------
def _shift_cols(x, offset, roll_sign):
    """z[:, m] = x[:, (m + offset) mod M]  (wrapped lanes are masked by caller)."""
    M = x.shape[-1]
    if offset % M == 0:
        return x
    return pltpu.roll(x, (roll_sign * (-offset)) % M, axis=1)


def _boundary_masks(H, W, M):
    """Per-tap validity masks (1, M) bool, built ONCE per resolution (opt #3).

    Lane m = img*H*W + h*W + w with H*W and W powers of two; the masks also kill
    any roll wrap-around across image boundaries within the fused lane axis."""
    col = jax.lax.broadcasted_iota(jnp.int32, (1, M), 1)
    pos = jnp.bitwise_and(col, H * W - 1)     # index within image
    wpos = jnp.bitwise_and(pos, W - 1)        # column within row
    up, down = pos >= W, pos < (H - 1) * W
    left, right = wpos >= 1, wpos <= W - 2
    masks = {}
    for dh in (-1, 0, 1):
        for dw in (-1, 0, 1):
            m = None
            for c in ((up if dh == -1 else down if dh == 1 else None),
                      (left if dw == -1 else right if dw == 1 else None)):
                if c is not None:
                    m = c if m is None else jnp.logical_and(m, c)
            masks[(dh, dw)] = m
    return masks


def _conv3x3(xb, w, b, W, masks, roll_sign, use_stack):
    """3x3 'same' conv, channel-major lane-dense.

    xb : (Cin, M) bf16, flat lane index = img*H*W + h*W + w
    w  : (Cout_rows, 9*Cin) bf16, columns grouped tap-major ((kh,kw), then ci)
    b  : (Cout_rows, 1) f32
    returns (Cout_rows, M) f32.

    use_stack=True (opt #2): shift+mask the INPUT 9x, concatenate to a
    (9*Cin, M) bf16 stack and do ONE MXU matmul (K = 9*Cin).
    use_stack=False: fallback -- 9 small per-tap matmuls accumulated in f32.
    """
    cin = xb.shape[0]
    taps = []
    for dh in (-1, 0, 1):
        for dw in (-1, 0, 1):
            t = _shift_cols(xb, dh * W + dw, roll_sign)
            m = masks[(dh, dw)]
            if m is not None:
                t = jnp.where(m, t, jnp.zeros_like(t))
            taps.append(t)
    if use_stack:
        stack = jnp.concatenate(taps, axis=0)                      # (9*Cin, M) bf16
        return jnp.dot(w, stack, preferred_element_type=jnp.float32) + b
    acc = None
    for k, t in enumerate(taps):
        p = jnp.dot(w[:, k * cin:(k + 1) * cin], t,
                    preferred_element_type=jnp.float32)
        acc = p if acc is None else acc + p
    return acc + b


# ---------------------------------------------------------------------------
# one-time host-side parameter packing (opt #5)
# ---------------------------------------------------------------------------
def _pack3x3(w, b, cin_pad=None):
    """torch (Cout,Cin,3,3) -> (Cout, 9*Cin) with tap-major columns."""
    w = np.asarray(w, np.float32)
    cout, cin = w.shape[0], w.shape[1]
    if cin_pad is not None and cin_pad > cin:
        wp = np.zeros((cout, cin_pad, 3, 3), np.float32)
        wp[:, :cin] = w
        w, cin = wp, cin_pad
    wk = np.transpose(w, (0, 2, 3, 1)).reshape(cout, 9 * cin)   # col = (kh*3+kw)*cin + ci
    return wk, np.asarray(b, np.float32).reshape(cout, 1)


def _pool_matrix(H, W):
    """(H*W, H/2*W/2) 2x2 average-pooling matrix (entries 0 / 0.25, exact in bf16)."""
    P = np.zeros((H * W, (H // 2) * (W // 2)), np.float32)
    for h in range(H):
        for w in range(W):
            P[h * W + w, (h // 2) * (W // 2) + (w // 2)] = 0.25
    return P


def pack_params(params, imgs_per_step=_IMGS_PER_STEP):
    """Pack BigGAN_Dis(resolution=32) parameters into the kernel layout ONCE."""
    blocks = params["blocks"]
    assert len(blocks) == 4
    assert [b["downsample"] for b in blocks] == [True, True, False, False]
    assert [b["learnable_sc"] for b in blocks] == [True, True, False, False]
    C = blocks[0]["conv2_w"].shape[0]
    g = imgs_per_step

    bf = lambda a: jnp.asarray(a, jnp.bfloat16)
    f32 = lambda a: jnp.asarray(a, jnp.float32)

    # block 0: pad Cin 3 -> C and fold the 1x1 shortcut into conv1's matmul
    # as extra output rows that read only the centre tap (opt #6).
    b0 = blocks[0]
    w01, b01 = _pack3x3(b0["conv1_w"], b0["conv1_b"], cin_pad=C)
    sc_w = np.asarray(b0["sc_w"], np.float32).reshape(C, -1)          # (C, 3)
    w01_ext = np.zeros((2 * C, 9 * C), np.float32)
    w01_ext[:C] = w01
    w01_ext[C:, 4 * C:4 * C + sc_w.shape[1]] = sc_w                   # centre tap k=4
    b01_ext = np.concatenate(
        [b01, np.asarray(b0["sc_b"], np.float32).reshape(C, 1)], axis=0)
    w02, b02 = _pack3x3(b0["conv2_w"], b0["conv2_b"])

    b1 = blocks[1]
    w11, b11 = _pack3x3(b1["conv1_w"], b1["conv1_b"])
    w12, b12 = _pack3x3(b1["conv2_w"], b1["conv2_b"])
    wsc1 = np.asarray(b1["sc_w"], np.float32).reshape(C, C)
    bsc1 = np.asarray(b1["sc_b"], np.float32).reshape(C, 1)

    b2, b3 = blocks[2], blocks[3]
    w21, b21 = _pack3x3(b2["conv1_w"], b2["conv1_b"])
    w22, b22 = _pack3x3(b2["conv2_w"], b2["conv2_b"])
    w31, b31 = _pack3x3(b3["conv1_w"], b3["conv1_b"])
    w32, b32 = _pack3x3(b3["conv2_w"], b3["conv2_b"])

    # pooling matrices: per-image for 32->16; block-diagonal over the image
    # group for 16->8 so the pooled result lands directly in a 128-lane slab.
    p0 = _pool_matrix(32, 32)                                          # (1024, 256)
    p1 = _pool_matrix(16, 16)                                          # (256, 64)
    p1g = np.zeros((g * 256, g * 64), np.float32)
    for i in range(g):
        p1g[i * 256:(i + 1) * 256, i * 64:(i + 1) * 64] = p1

    # per-image spatial-sum selector at 8x8 (lane -> image column, padded to 128)
    sel = np.zeros((g * 64, 128), np.float32)
    for i in range(g):
        sel[i * 64:(i + 1) * 64, i] = 1.0

    return dict(
        w01=bf(w01_ext), b01=f32(b01_ext), w02=bf(w02), b02=f32(b02), p0=bf(p0),
        w11=bf(w11), b11=f32(b11), wsc1=bf(wsc1), bsc1=f32(bsc1),
        w12=bf(w12), b12=f32(b12), p1=bf(p1g),
        w21=bf(w21), b21=f32(b21), w22=bf(w22), b22=f32(b22),
        w31=bf(w31), b31=f32(b31), w32=bf(w32), b32=f32(b32),
        sel=f32(sel),
        obw=f32(np.asarray(params["ob_w"], np.float32).reshape(1, C)),
        obb=f32(np.asarray(params["ob_b"], np.float32).reshape(1, 1)),
    )


# ---------------------------------------------------------------------------
# fused forward: ONE pallas_call for the whole network (opt #1, #4)
# ---------------------------------------------------------------------------
def biggan_dis_forward(packed, x_nchw, *, roll_sign, use_stack=True):
    """BigGAN_Dis (resolution=32, sn/sa/bn off, c_metric='') forward pass."""
    C = packed["w02"].shape[0]
    g = packed["p1"].shape[1] // 64
    B, Cin, H, W = x_nchw.shape
    assert (Cin, H, W) == (3, 32, 32), "resolution-32 arch expects (B, 3, 32, 32)"
    assert B % g == 0, f"batch must be a multiple of {g}"
    n_groups = B // g
    M0, M1, M2 = g * 1024, g * 256, g * 64

    # tiny plain-JAX glue: NCHW -> channel-major lane-dense bf16, channels 3 -> C
    # zero-padded so every conv uses the same aligned stacked-matmul path.
    xc = jnp.transpose(x_nchw.astype(jnp.float32), (1, 0, 2, 3)).reshape(3, B * H * W)
    x_pad = jnp.concatenate(
        [xc, jnp.zeros((C - 3, B * H * W), jnp.float32)], axis=0).astype(jnp.bfloat16)

    def kernel(x_ref, w01_ref, b01_ref, w02_ref, b02_ref, p0_ref,
               w11_ref, b11_ref, wsc1_ref, bsc1_ref, w12_ref, b12_ref, p1_ref,
               w21_ref, b21_ref, w22_ref, b22_ref,
               w31_ref, b31_ref, w32_ref, b32_ref,
               sel_ref, obw_ref, obb_ref, o_ref):
        conv = functools.partial(_conv3x3, roll_sign=roll_sign, use_stack=use_stack)
        m32 = _boundary_masks(32, 32, M0)     # built once per resolution (opt #3)
        m16 = _boundary_masks(16, 16, M1)
        m8 = _boundary_masks(8, 8, M2)

        # ---- block 0: conv1 (+ folded 1x1 shortcut), relu, conv2, add, pool ----
        xb = x_ref[...]                                              # (C, M0) bf16
        y = conv(xb, w01_ref[...], b01_ref[...], 32, m32)            # (2C, M0) f32
        sc = y[C:]
        h = jnp.maximum(y[:C], 0.0).astype(jnp.bfloat16)
        h = conv(h, w02_ref[...], b02_ref[...], 32, m32)             # (C, M0) f32
        s0 = (h + sc).astype(jnp.bfloat16)
        p0 = p0_ref[...]
        x1 = jnp.concatenate(
            [jnp.dot(s0[:, i * 1024:(i + 1) * 1024], p0,
                     preferred_element_type=jnp.float32) for i in range(g)],
            axis=1)                                                  # (C, M1) f32

        # ---- block 1: preact, conv1, relu, conv2, 1x1 shortcut(x), add, pool ----
        x1b = x1.astype(jnp.bfloat16)
        h = jnp.maximum(x1, 0.0).astype(jnp.bfloat16)
        h = conv(h, w11_ref[...], b11_ref[...], 16, m16)
        h = jnp.maximum(h, 0.0).astype(jnp.bfloat16)
        h = conv(h, w12_ref[...], b12_ref[...], 16, m16)
        sc = jnp.dot(wsc1_ref[...], x1b,
                     preferred_element_type=jnp.float32) + bsc1_ref[...]
        s1 = (h + sc).astype(jnp.bfloat16)
        x2 = jnp.dot(s1, p1_ref[...], preferred_element_type=jnp.float32)   # (C, M2)

        # ---- blocks 2 & 3: preact, identity shortcuts, no pool ----
        def plain_block(xin, w1, b1, w2, b2):
            t = jnp.maximum(xin, 0.0).astype(jnp.bfloat16)
            t = conv(t, w1, b1, 8, m8)
            t = jnp.maximum(t, 0.0).astype(jnp.bfloat16)
            t = conv(t, w2, b2, 8, m8)
            return xin + t

        x3 = plain_block(x2, w21_ref[...], b21_ref[...], w22_ref[...], b22_ref[...])
        x4 = plain_block(x3, w31_ref[...], b31_ref[...], w32_ref[...], b32_ref[...])

        # ---- head: relu -> per-image spatial sum -> linear ----
        r = jnp.maximum(x4, 0.0)                                     # (C, M2) f32
        hs = jnp.dot(r, sel_ref[...], preferred_element_type=jnp.float32)   # (C, 128)
        out = jnp.dot(obw_ref[...], hs,
                      preferred_element_type=jnp.float32) + obb_ref[...]     # (1, 128)
        o_ref[...] = out

    consts = (packed["w01"], packed["b01"], packed["w02"], packed["b02"], packed["p0"],
              packed["w11"], packed["b11"], packed["wsc1"], packed["bsc1"],
              packed["w12"], packed["b12"], packed["p1"],
              packed["w21"], packed["b21"], packed["w22"], packed["b22"],
              packed["w31"], packed["b31"], packed["w32"], packed["b32"],
              packed["sel"], packed["obw"], packed["obb"])

    def const_spec(a):
        return pl.BlockSpec(a.shape, lambda i: (0, 0))

    out = pl.pallas_call(
        kernel,
        out_shape=jax.ShapeDtypeStruct((1, n_groups * 128), jnp.float32),
        grid=(n_groups,),
        in_specs=[pl.BlockSpec((C, M0), lambda i: (0, i))]
                 + [const_spec(a) for a in consts],
        out_specs=pl.BlockSpec((1, 128), lambda i: (0, i)),
        compiler_params=pltpu.CompilerParams(dimension_semantics=("parallel",)),
    )(x_pad, *consts)

    logits = out[0].reshape(n_groups, 128)[:, :g].reshape(B, 1)
    return logits, None   # c_metric='' -> no class output


# ---------------------------------------------------------------------------
# pure-JAX f32 reference of the PyTorch module (for validation only)
# ---------------------------------------------------------------------------
def _reference_forward(params, x):
    P = jax.lax.Precision.HIGHEST

    def conv(h, w, b, pad):
        out = jax.lax.conv_general_dilated(
            h, w, (1, 1), ((pad, pad), (pad, pad)),
            dimension_numbers=("NCHW", "OIHW", "NCHW"), precision=P)
        return out + b.reshape(1, -1, 1, 1)

    def pool(h):
        b, c, hh, ww = h.shape
        return h.reshape(b, c, hh // 2, 2, ww // 2, 2).mean(axis=(3, 5))

    h = x
    for blk in params["blocks"]:
        xin = h
        t = jax.nn.relu(h) if blk["preact"] else h
        t = conv(t, blk["conv1_w"], blk["conv1_b"], 1)
        t = conv(jax.nn.relu(t), blk["conv2_w"], blk["conv2_b"], 1)
        if blk["downsample"]:
            t = pool(t)
        s = xin
        if blk["preact"]:
            if blk["learnable_sc"]:
                s = conv(s, blk["sc_w"], blk["sc_b"], 0)
            if blk["downsample"]:
                s = pool(s)
        else:
            if blk["downsample"]:
                s = pool(s)
            if blk["learnable_sc"]:
                s = conv(s, blk["sc_w"], blk["sc_b"], 0)
        h = t + s
    h = jax.nn.relu(h)
    hsum = jnp.sum(jax.nn.relu(h), axis=(2, 3))                       # (B, C)
    return jnp.dot(hsum, params["ob_w"].T, precision=P) + params["ob_b"].reshape(1, 1)


# ---------------------------------------------------------------------------
# deterministic parameter construction (D_ch=4, resolution=32 arch)
# ---------------------------------------------------------------------------
def make_params(key, ch=4):
    in_ch = [3, 4 * ch, 4 * ch, 4 * ch]
    out_ch = [4 * ch] * 4
    down = [True, True, False, False]
    blocks = []
    for i in range(4):
        cin, cout, hid = in_ch[i], out_ch[i], out_ch[i]              # wide=True
        learnable_sc = (cin != cout) or down[i]
        key, *ks = jax.random.split(key, 7)
        blk = {
            "conv1_w": 0.1 * jax.random.normal(ks[0], (hid, cin, 3, 3), jnp.float32),
            "conv1_b": 0.02 * jax.random.normal(ks[1], (hid,), jnp.float32),
            "conv2_w": 0.1 * jax.random.normal(ks[2], (cout, hid, 3, 3), jnp.float32),
            "conv2_b": 0.02 * jax.random.normal(ks[3], (cout,), jnp.float32),
            "downsample": down[i], "learnable_sc": learnable_sc, "preact": i > 0,
        }
        if learnable_sc:
            blk["sc_w"] = 0.1 * jax.random.normal(ks[4], (cout, cin, 1, 1), jnp.float32)
            blk["sc_b"] = 0.02 * jax.random.normal(ks[5], (cout,), jnp.float32)
        blocks.append(blk)
    key, k1, k2 = jax.random.split(key, 3)
    return {"blocks": blocks,
            "ob_w": 0.1 * jax.random.normal(k1, (1, out_ch[-1]), jnp.float32),
            "ob_b": 0.02 * jax.random.normal(k2, (1,), jnp.float32)}


if __name__ == "__main__":
    root = jax.random.PRNGKey(0)
    pkey, xkey = jax.random.split(root)
    params = make_params(pkey, ch=4)
    x = jax.random.normal(xkey, (2, 3, 32, 32), jnp.float32)      # NCHW, resolution=32

    packed = pack_params(params)                                   # one-time packing
    rs = _get_roll_sign()

    fwd = jax.jit(functools.partial(biggan_dis_forward, roll_sign=rs, use_stack=True))
    try:
        out_b, out_c = fwd(packed, x)
        out_b = jax.block_until_ready(out_b)
    except Exception:
        # TODO(synk): fallback if this toolchain rejects the 9-tap sublane concat;
        # the per-tap accumulation path is used instead (same math, slightly slower).
        fwd = jax.jit(functools.partial(biggan_dis_forward, roll_sign=rs, use_stack=False))
        out_b, out_c = fwd(packed, x)
        out_b = jax.block_until_ready(out_b)

    assert out_b.shape == (2, 1) and out_b.dtype == jnp.float32
    assert out_c is None

    # correctness vs pure-JAX f32 reference (bf16 MXU tolerance)
    ref_b = _reference_forward(params, x)
    err = float(jnp.max(jnp.abs(out_b - ref_b)))
    scale = max(1.0, float(jnp.max(jnp.abs(ref_b))))
    assert err <= 0.08 * scale + 0.02, f"kernel vs reference mismatch: {err} (scale {scale})"

    print("KERNEL_OK")
</pallas_src>

<mosaic_0001>
module attributes {stable_mosaic.version = 11 : i64} {
  func.func @probe(%arg0: memref<8x128xf32, #tpu.memory_space<vmem>>, %arg1: memref<8x128xf32, #tpu.memory_space<vmem>>) attributes {dimension_semantics = [], scalar_prefetch = 0 : i64, scratch_operands = 0 : i64, tpu.core_type = #tpu.core_type<tc>} {
    %c0 = arith.constant 0 : index
    %c0_0 = arith.constant 0 : index
    %0 = vector.load %arg0[%c0, %c0_0] : memref<8x128xf32, #tpu.memory_space<vmem>>, vector<8x128xf32>
    %c1_i32 = arith.constant 1 : i32
    %1 = tpu.dynamic_rotate %0 by %c1_i32 dim 1 : vector<8x128xf32>, i32 -> vector<8x128xf32>
    %c0_1 = arith.constant 0 : index
    %c0_2 = arith.constant 0 : index
    %2 = vector.load %arg1[%c0_1, %c0_2] : memref<8x128xf32, #tpu.memory_space<vmem>>, vector<8x128xf32>
    tpu.vector_store %arg1[%c0_1, %c0_2], %1 {strides = array<i32>} : memref<8x128xf32, #tpu.memory_space<vmem>>, vector<8x128xf32>,
    return
  }
}

</mosaic_0001>

<bundles_post_ra>
// kernel: tpu_custom_call.1
= control target key start
LH: loop header
LB: loop body
LE: loop exit
PB: predicated region body
PF: predicated region fallthrough
CT: control target
= control target key end

     0   :  { %6 = vsyncpa [#allocation3], 0  ;;  %s118_s0 = inlined_call_operand.hbm [shape: f32[8,128], index: 0, kind: input, shape index: {}]   ;;  %s119_s1 = inlined_call_operand.hbm [shape: f32[8,128], index: 1, kind: output, shape index: {}]  }
   0x1   :  { %7 = vsyncpa [#allocation4], 0  ;;  %s13_s8 = sshll.u32 %s118_s0, 4  ;;  %s99_s9 = smov [#allocation2]   ;;  %s14_s8 = int_to_ptr.hbm [resolvable:$true] %s13_s8 }
   0x2   :  { %s15_s10 = sshll.u32 %s99_s9, 4  ;;  %s16_s10 = int_to_ptr.vmem [resolvable:$true] %s15_s10 }
   0x3   :  { %18 = dma.hbm_to_vmem [thread:$0]  %s14_s8, 128, %s16_s10, [#allocation3]  }
   0x4   :  { %95 = dma.done.wait [#allocation3], 128  }
   0x5   :  { %96 = vsyncadd [#allocation3], 4294967168  ;;  %v23_v0 = vld [vmem:[#allocation2] sm:$0xff]  ;;  %s100_s11 = smov 1   ;;  %s101_s12 = smov [#allocation5]  }
   0x6   :  { %24 = vrot.lane.b32.xlu0 %v23_v0, %s100_s11  ;;  %s32_s13 = sshll.u32 %s101_s12, 4  ;;  %s34_s16 = sshll.u32 %s119_s1, 4  ;;  %s33_s13 = int_to_ptr.vmem [resolvable:$true] %s32_s13  ;;  %s35_s16 = int_to_ptr.hbm [resolvable:$true] %s34_s16 }
  0x78   :  { %v25_v1 = vpop.permute.xlu0 %24 }
  0x79   :  { %26 = vst [vmem:[#allocation5] sm:$0xff] %v25_v1 }
  0x7a   :  { %37 = dma.vmem_to_hbm [thread:$0]  %s33_s13, 128, %s35_s16, [#allocation4]  }
  0x7b   :  { %97 = dma.done.wait [#allocation4], 128  }
  0x7c   :  { %98 = vsyncadd [#allocation4], 4294967168 }
  0x7d   :  { %42 = vsyncpa [#allocation3], 1 }
  0x7e   :  { %43 = vsyncpa [#allocation4], 1 }

</bundles_post_ra>
